<compile_context>
chip_gen: v7x
topology: tpu7x:2x2x1
jax: 0.10.0
libtpu: 0.0.40
codegen_flags: <defaults>
</compile_context>

<pallas_src>
import functools

import jax
import jax.numpy as jnp
from jax import lax
from jax.experimental import pallas as pl
from jax.experimental.pallas import tpu as pltpu

_BN_EPS = 1e-5
_LANE = 128
_TILE_P_CAP = 2048
_VMEM_LIMIT = 32 * 1024 * 1024


def _round_up(x, m):
    return (x + m - 1) // m * m


def _pick_tiles(p, k_pad):
    """Balanced P tiles: near-equal tiles <= cap, multiple of 16, minimal pad."""
    # Cap the dominant (tile_p, k_pad) bf16 input stream at ~2 MiB per buffer.
    cap = max(256, min(_TILE_P_CAP, (2 * 1024 * 1024) // max(2 * k_pad, 1)))
    n_tiles = -(-p // cap)
    tile_p = _round_up(-(-p // n_tiles), 16)        # bf16-safe sublane multiple
    return tile_p, n_tiles, n_tiles * tile_p


# ----------------------------------------------------------------------------
# Pass 1 kernel: tiled matmul (bf16 in / f32 acc) + per-tile partial stats.
# Stats are emitted as one (8, C) block per tile: row 0 = sum, row 1 = sumsq.
# No cross-iteration accumulation -> axis is "parallel" (2-TC on v7x).
# ----------------------------------------------------------------------------
def _matmul_stats_kernel(p_ref, w_ref, y_ref, stats_ref):
    y = jnp.dot(p_ref[...], w_ref[...], preferred_element_type=jnp.float32)
    y_ref[...] = y.astype(y_ref.dtype)                       # bf16 store
    col_sum = jnp.sum(y, axis=0, keepdims=True)
    col_ssq = jnp.sum(y * y, axis=0, keepdims=True)
    pad_rows = jnp.zeros((6, y.shape[1]), jnp.float32)
    stats_ref[...] = jnp.concatenate([col_sum, col_ssq, pad_rows], axis=0)


def _matmul_stats(patches_pad, w_pad, tile_p, n_tiles):
    p_pad, k_pad = patches_pad.shape
    c_pad = w_pad.shape[1]
    return pl.pallas_call(
        _matmul_stats_kernel,
        out_shape=(
            jax.ShapeDtypeStruct((p_pad, c_pad), jnp.bfloat16),
            jax.ShapeDtypeStruct((n_tiles * 8, c_pad), jnp.float32),
        ),
        grid=(n_tiles,),
        in_specs=[
            pl.BlockSpec((tile_p, k_pad), lambda i: (i, 0)),
            pl.BlockSpec((k_pad, c_pad), lambda i: (0, 0)),
        ],
        out_specs=(
            pl.BlockSpec((tile_p, c_pad), lambda i: (i, 0)),
            pl.BlockSpec((8, c_pad), lambda i: (i, 0)),
        ),
        compiler_params=pltpu.CompilerParams(
            dimension_semantics=("parallel",),
            vmem_limit_bytes=_VMEM_LIMIT),
    )(patches_pad, w_pad)


# ----------------------------------------------------------------------------
# Pass 2 kernel: y * scale + bias (+skip) (+ReLU), fully parallel over P tiles.
# y / skip stream in bf16, math in f32, output dtype configurable.
# ----------------------------------------------------------------------------
def _bn_apply_kernel(*refs, relu, use_skip):
    if use_skip:
        y_ref, s_ref, b_ref, k_ref, o_ref = refs
    else:
        y_ref, s_ref, b_ref, o_ref = refs
        k_ref = None

    out = y_ref[...].astype(jnp.float32) * s_ref[...] + b_ref[...]
    if use_skip:
        out = out + k_ref[...].astype(jnp.float32)
    if relu:
        out = jnp.maximum(out, 0.0)
    o_ref[...] = out.astype(o_ref.dtype)


def _bn_apply(y_pad, scale_row, bias_row, skip_pad, relu, tile_p, out_dtype):
    p_pad, c_pad = y_pad.shape
    n_tiles = p_pad // tile_p
    use_skip = skip_pad is not None

    inputs = [y_pad, scale_row, bias_row]
    in_specs = [
        pl.BlockSpec((tile_p, c_pad), lambda i: (i, 0)),
        pl.BlockSpec((1, c_pad), lambda i: (0, 0)),
        pl.BlockSpec((1, c_pad), lambda i: (0, 0)),
    ]
    if use_skip:
        inputs.append(skip_pad)
        in_specs.append(pl.BlockSpec((tile_p, c_pad), lambda i: (i, 0)))

    kernel = functools.partial(_bn_apply_kernel, relu=relu, use_skip=use_skip)
    return pl.pallas_call(
        kernel,
        out_shape=jax.ShapeDtypeStruct((p_pad, c_pad), out_dtype),
        grid=(n_tiles,),
        in_specs=in_specs,
        out_specs=pl.BlockSpec((tile_p, c_pad), lambda i: (i, 0)),
        compiler_params=pltpu.CompilerParams(
            dimension_semantics=("parallel",),
            vmem_limit_bytes=_VMEM_LIMIT),
    )(*inputs)


# ----------------------------------------------------------------------------
# One conv(-transpose) + BN(training) + optional skip + optional ReLU stage.
# Columns of w_mat are ordered group-major (g * Cout + c); plain convs have
# groups == 1, the sub-pixel deconv has groups == 4 (one group per parity).
# ----------------------------------------------------------------------------
def _conv_bn_stage(patches, w_mat, gamma_c, beta_c, bn_count,
                   groups=1, skip_cols=None, relu=True,
                   out_dtype=jnp.bfloat16):
    P, K = patches.shape
    c_tot = w_mat.shape[1]
    cout = c_tot // groups

    k_pad = _round_up(K, _LANE)
    c_pad = _round_up(c_tot, _LANE)
    tile_p, n_tiles, p_pad = _pick_tiles(P, k_pad)

    # Patches are already bf16; padded rows/cols are zero so they contribute
    # nothing to the matmul or the BN statistics.
    patches_pad = jnp.pad(patches.astype(jnp.bfloat16),
                          ((0, p_pad - P), (0, k_pad - K)))
    w_pad = jnp.pad(w_mat.astype(jnp.bfloat16),
                    ((0, k_pad - K), (0, c_pad - c_tot)))

    # Pass 1: matmul + per-tile per-column partial statistics.
    y_pad, stats = _matmul_stats(patches_pad, w_pad, tile_p, n_tiles)
    stats = stats.reshape(n_tiles, 8, c_pad)
    col_sum = jnp.sum(stats[:, 0, :c_tot], axis=0)
    col_ssq = jnp.sum(stats[:, 1, :c_tot], axis=0)

    # Fold training-mode BatchNorm into a per-channel scale / bias (tiny glue).
    s = col_sum.reshape(groups, cout).sum(axis=0)
    ss = col_ssq.reshape(groups, cout).sum(axis=0)
    mean = s / bn_count
    var = jnp.maximum(ss / bn_count - mean * mean, 0.0)     # biased variance
    scale = gamma_c.astype(jnp.float32) * lax.rsqrt(var + _BN_EPS)
    bias = beta_c.astype(jnp.float32) - mean * scale
    scale_row = jnp.pad(jnp.tile(scale, groups),
                        (0, c_pad - c_tot)).reshape(1, c_pad)
    bias_row = jnp.pad(jnp.tile(bias, groups),
                       (0, c_pad - c_tot)).reshape(1, c_pad)

    skip_pad = None
    if skip_cols is not None:
        skip_pad = jnp.pad(skip_cols.astype(jnp.bfloat16),
                           ((0, p_pad - P), (0, c_pad - c_tot)))

    out_pad = _bn_apply(y_pad, scale_row, bias_row, skip_pad, relu,
                        tile_p, out_dtype)
    return out_pad[:P, :c_tot]


# ----------------------------------------------------------------------------
# Plain-JAX glue: patch extraction (bf16, single HBM materialization) and
# weight packing.
# ----------------------------------------------------------------------------
def _im2col_3x3(x_nhwc, stride, pad):
    N, H, W, C = x_nhwc.shape
    xp = jnp.pad(x_nhwc, ((0, 0), (pad, pad), (pad, pad), (0, 0)))
    Ho = (H + 2 * pad - 3) // stride + 1
    Wo = (W + 2 * pad - 3) // stride + 1
    cols = []
    for kh in range(3):
        for kw in range(3):
            cols.append(xp[:, kh:kh + stride * Ho:stride,
                           kw:kw + stride * Wo:stride, :])
    p = jnp.stack(cols, axis=3)                       # (N, Ho, Wo, 9, C)
    return p.reshape(N * Ho * Wo, 9 * C), (N, Ho, Wo)


def _conv_weight_to_mat(w_oihw):
    # (Cout, Cin, kH, kW) -> (kH*kW*Cin, Cout); tap-major to match _im2col_3x3.
    cout = w_oihw.shape[0]
    return jnp.transpose(w_oihw, (2, 3, 1, 0)).reshape(-1, cout)


def _im2col_2x2_subpixel(x_nhwc):
    # 2x2 neighborhood (zero-padded bottom/right) for the sub-pixel deconv.
    N, H, W, C = x_nhwc.shape
    xp = jnp.pad(x_nhwc, ((0, 0), (0, 1), (0, 1), (0, 0)))
    cols = []
    for di in range(2):
        for dj in range(2):
            cols.append(xp[:, di:di + H, dj:dj + W, :])
    p = jnp.stack(cols, axis=3)                       # (N, H, W, 4, C)
    return p.reshape(N * H * W, 4 * C), (N, H, W)


def _convt_weight_subpixel(w_iohw):
    # ConvTranspose2d weight (Cin, Cout, 3, 3), stride=2, pad=1, out_pad=1.
    # Output parity (a,b) at tap (di,dj) uses kernel element (a+1-2di, b+1-2dj)
    # when in range, else 0.  -> (4*Cin, 4*Cout), columns parity-major.
    cin, cout = w_iohw.shape[0], w_iohw.shape[1]
    wm = jnp.zeros((4 * cin, 4 * cout), w_iohw.dtype)
    for a in range(2):
        for b in range(2):
            pidx = a * 2 + b
            for di in range(2):
                for dj in range(2):
                    kh = a + 1 - 2 * di
                    kw = b + 1 - 2 * dj
                    if 0 <= kh <= 2 and 0 <= kw <= 2:
                        t = di * 2 + dj
                        wm = wm.at[t * cin:(t + 1) * cin,
                                   pidx * cout:(pidx + 1) * cout].set(
                            w_iohw[:, :, kh, kw])
    return wm


def _subpixel_to_nhwc(y_cols, N, H, W, cout):
    # (N*H*W, 4*Cout) with columns (a*2+b)*Cout + c  ->  (N, 2H, 2W, Cout)
    y = y_cols.reshape(N, H, W, 2, 2, cout)
    y = jnp.transpose(y, (0, 1, 3, 2, 4, 5))
    return y.reshape(N, 2 * H, 2 * W, cout)


def _nhwc_to_subpixel(x_nhwc):
    # Inverse of _subpixel_to_nhwc (for skip tensors at output resolution).
    N, H2, W2, C = x_nhwc.shape
    H, W = H2 // 2, W2 // 2
    x = x_nhwc.reshape(N, H, 2, W, 2, C)
    x = jnp.transpose(x, (0, 1, 3, 2, 4, 5))
    return x.reshape(N * H * W, 4 * C)


# ----------------------------------------------------------------------------
# Stage runners + hourglass forward
# ----------------------------------------------------------------------------
def _run_convbn(x_nhwc, w_oihw, gamma, beta, stride, skip_nhwc=None, relu=True,
                out_dtype=jnp.bfloat16):
    patches, (N, Ho, Wo) = _im2col_3x3(x_nhwc, stride, 1)
    w_mat = _conv_weight_to_mat(w_oihw)
    cout = w_oihw.shape[0]
    skip = None if skip_nhwc is None else skip_nhwc.reshape(N * Ho * Wo, cout)
    out = _conv_bn_stage(patches, w_mat, gamma, beta, bn_count=N * Ho * Wo,
                         groups=1, skip_cols=skip, relu=relu,
                         out_dtype=out_dtype)
    return out.reshape(N, Ho, Wo, cout)


def _run_convtbn(x_nhwc, w_iohw, gamma, beta, skip_nhwc=None, relu=True,
                 out_dtype=jnp.bfloat16):
    # ConvTranspose2d(k=3, stride=2, pad=1, out_pad=1) via sub-pixel decomposition.
    patches, (N, H, W) = _im2col_2x2_subpixel(x_nhwc)
    w_mat = _convt_weight_subpixel(w_iohw)
    cout = w_iohw.shape[1]
    skip = None if skip_nhwc is None else _nhwc_to_subpixel(skip_nhwc)
    out = _conv_bn_stage(patches, w_mat, gamma, beta,
                         bn_count=N * (2 * H) * (2 * W),
                         groups=4, skip_cols=skip, relu=relu,
                         out_dtype=out_dtype)
    return _subpixel_to_nhwc(out, N, H, W, cout)


def _hourglass_forward(params, x_nchw, presqu=None, postsqu=None):
    """Matches hourglass.forward(x, presqu, postsqu). I/O tensors are NCHW."""
    x = jnp.transpose(x_nchw, (0, 2, 3, 1)).astype(jnp.bfloat16)      # NHWC bf16
    presqu_h = None if presqu is None else \
        jnp.transpose(presqu, (0, 2, 3, 1)).astype(jnp.bfloat16)
    postsqu_h = None if postsqu is None else \
        jnp.transpose(postsqu, (0, 2, 3, 1)).astype(jnp.bfloat16)

    # conv1: convbn stride 2 + ReLU
    out = _run_convbn(x, params["w1"], params["g1"], params["b1"], stride=2, relu=True)
    # conv2: convbn stride 1, then (+ postsqu), ReLU
    pre = _run_convbn(out, params["w2"], params["g2"], params["b2"], stride=1,
                      skip_nhwc=postsqu_h, relu=True)
    # conv3: convbn stride 2 + ReLU
    out = _run_convbn(pre, params["w3"], params["g3"], params["b3"], stride=2, relu=True)
    # conv4: convbn stride 1 + ReLU
    out = _run_convbn(out, params["w4"], params["g4"], params["b4"], stride=1, relu=True)
    # conv5: convtranspose + BN, + (presqu or pre), ReLU
    skip5 = presqu_h if presqu_h is not None else pre
    post = _run_convtbn(out, params["w5"], params["g5"], params["b5"],
                        skip_nhwc=skip5, relu=True)
    # conv6: convtranspose + BN (no skip, no ReLU); final output in f32.
    out = _run_convtbn(post, params["w6"], params["g6"], params["b6"],
                       skip_nhwc=None, relu=False, out_dtype=jnp.float32)

    return jnp.transpose(out, (0, 3, 1, 2))                       # back to NCHW


hourglass_forward = jax.jit(_hourglass_forward)


def init_params(key, inplanes):
    c2 = inplanes * 2
    ks = jax.random.split(key, 6)
    scale = 0.1
    return {
        # Conv2d weights: (Cout, Cin, kH, kW)
        "w1": jax.random.normal(ks[0], (c2, inplanes, 3, 3), jnp.float32) * scale,
        "w2": jax.random.normal(ks[1], (c2, c2, 3, 3), jnp.float32) * scale,
        "w3": jax.random.normal(ks[2], (c2, c2, 3, 3), jnp.float32) * scale,
        "w4": jax.random.normal(ks[3], (c2, c2, 3, 3), jnp.float32) * scale,
        # ConvTranspose2d weights: (Cin, Cout, kH, kW)
        "w5": jax.random.normal(ks[4], (c2, c2, 3, 3), jnp.float32) * scale,
        "w6": jax.random.normal(ks[5], (c2, inplanes, 3, 3), jnp.float32) * scale,
        # BatchNorm affine params (PyTorch defaults: gamma=1, beta=0)
        "g1": jnp.ones((c2,), jnp.float32), "b1": jnp.zeros((c2,), jnp.float32),
        "g2": jnp.ones((c2,), jnp.float32), "b2": jnp.zeros((c2,), jnp.float32),
        "g3": jnp.ones((c2,), jnp.float32), "b3": jnp.zeros((c2,), jnp.float32),
        "g4": jnp.ones((c2,), jnp.float32), "b4": jnp.zeros((c2,), jnp.float32),
        "g5": jnp.ones((c2,), jnp.float32), "b5": jnp.zeros((c2,), jnp.float32),
        "g6": jnp.ones((inplanes,), jnp.float32), "b6": jnp.zeros((inplanes,), jnp.float32),
    }


if __name__ == "__main__":
    key = jax.random.PRNGKey(0)
    k_param, k_x = jax.random.split(key)

    inplanes = 4
    N, H, W = 2, 16, 16
    params = init_params(k_param, inplanes)
    x = jax.random.normal(k_x, (N, inplanes, H, W), jnp.float32)

    # forward(x, presqu=None, postsqu=None)
    out = hourglass_forward(params, x, presqu=None, postsqu=None)
    out = jax.block_until_ready(out)

    assert out.shape == (N, inplanes, H, W), out.shape
    assert jnp.all(jnp.isfinite(out))
    print("KERNEL_OK")
</pallas_src>

<mosaic_0001>
module attributes {stable_mosaic.version = 11 : i64} {
  func.func @_bn_apply_kernel(%arg0: i32, %arg1: memref<128x128xbf16, #tpu.memory_space<vmem>>, %arg2: memref<1x128xf32, #tpu.memory_space<vmem>>, %arg3: memref<1x128xf32, #tpu.memory_space<vmem>>, %arg4: memref<128x128xbf16, #tpu.memory_space<vmem>>) attributes {dimension_semantics = [#tpu.dimension_semantics<parallel>], iteration_bounds = array<i64: 1>, scalar_prefetch = 0 : i64, scratch_operands = 0 : i64, tpu.core_type = #tpu.core_type<tc>, window_params = [{transform_indices = @transform_0, window_bounds = array<i64: 128, 128>}, {pipeline_mode = #tpu.pipeline_mode<synchronous>, transform_indices = @transform_1, window_bounds = array<i64: 1, 128>}, {pipeline_mode = #tpu.pipeline_mode<synchronous>, transform_indices = @transform_2, window_bounds = array<i64: 1, 128>}, {transform_indices = @transform_3, window_bounds = array<i64: 128, 128>}]} {
    %c0 = arith.constant 0 : index
    %c0_0 = arith.constant 0 : index
    %0 = vector.load %arg1[%c0, %c0_0] : memref<128x128xbf16, #tpu.memory_space<vmem>>, vector<128x128xbf16>
    %1 = arith.extf %0 : vector<128x128xbf16> to vector<128x128xf32>
    %c0_1 = arith.constant 0 : index
    %c0_2 = arith.constant 0 : index
    %2 = vector.load %arg2[%c0_1, %c0_2] : memref<1x128xf32, #tpu.memory_space<vmem>>, vector<1x128xf32>
    %3 = vector.broadcast %2 : vector<1x128xf32> to vector<128x128xf32>
    %4 = arith.mulf %1, %3 : vector<128x128xf32>
    %c0_3 = arith.constant 0 : index
    %c0_4 = arith.constant 0 : index
    %5 = vector.load %arg3[%c0_3, %c0_4] : memref<1x128xf32, #tpu.memory_space<vmem>>, vector<1x128xf32>
    %6 = vector.broadcast %5 : vector<1x128xf32> to vector<128x128xf32>
    %7 = arith.addf %4, %6 : vector<128x128xf32>
    %cst = arith.constant 0.000000e+00 : f32
    %8 = vector.broadcast %cst : f32 to vector<128x128xf32>
    %9 = arith.maximumf %7, %8 : vector<128x128xf32>
    %10 = arith.truncf %9 : vector<128x128xf32> to vector<128x128xbf16>
    %c0_5 = arith.constant 0 : index
    %c0_6 = arith.constant 0 : index
    %11 = vector.load %arg4[%c0_5, %c0_6] : memref<128x128xbf16, #tpu.memory_space<vmem>>, vector<128x128xbf16>
    tpu.vector_store %arg4[%c0_5, %c0_6], %10 {strides = array<i32>} : memref<128x128xbf16, #tpu.memory_space<vmem>>, vector<128x128xbf16>,
    return
  }
  func.func @transform_0(%arg0: i32) -> (i32, i32) {
    %c0_i32 = arith.constant 0 : i32
    %c0_i32_0 = arith.constant 0 : i32
    return %arg0, %c0_i32 : i32, i32
  }
  func.func @transform_1(%arg0: i32) -> (i32, i32) {
    %c0_i32 = arith.constant 0 : i32
    %c0_i32_0 = arith.constant 0 : i32
    %c0_i32_1 = arith.constant 0 : i32
    return %c0_i32, %c0_i32_0 : i32, i32
  }
  func.func @transform_2(%arg0: i32) -> (i32, i32) {
    %c0_i32 = arith.constant 0 : i32
    %c0_i32_0 = arith.constant 0 : i32
    %c0_i32_1 = arith.constant 0 : i32
    return %c0_i32, %c0_i32_0 : i32, i32
  }
  func.func @transform_3(%arg0: i32) -> (i32, i32) {
    %c0_i32 = arith.constant 0 : i32
    %c0_i32_0 = arith.constant 0 : i32
    return %arg0, %c0_i32 : i32, i32
  }
}

module attributes {stable_mosaic.version = 11 : i64} {
  func.func @_matmul_stats_kernel(%arg0: i32, %arg1: memref<128x128xbf16, #tpu.memory_space<vmem>>, %arg2: memref<128x128xbf16, #tpu.memory_space<vmem>>, %arg3: memref<128x128xbf16, #tpu.memory_space<vmem>>, %arg4: memref<8x128xf32, #tpu.memory_space<vmem>>) attributes {dimension_semantics = [#tpu.dimension_semantics<parallel>], iteration_bounds = array<i64: 1>, scalar_prefetch = 0 : i64, scratch_operands = 0 : i64, tpu.core_type = #tpu.core_type<tc>, window_params = [{transform_indices = @transform_0, window_bounds = array<i64: 128, 128>}, {pipeline_mode = #tpu.pipeline_mode<synchronous>, transform_indices = @transform_1, window_bounds = array<i64: 128, 128>}, {transform_indices = @transform_2, window_bounds = array<i64: 128, 128>}, {transform_indices = @transform_3, window_bounds = array<i64: 8, 128>}]} {
    %c0 = arith.constant 0 : index
    %c0_0 = arith.constant 0 : index
    %0 = vector.load %arg1[%c0, %c0_0] : memref<128x128xbf16, #tpu.memory_space<vmem>>, vector<128x128xbf16>
    %c0_1 = arith.constant 0 : index
    %c0_2 = arith.constant 0 : index
    %1 = vector.load %arg2[%c0_1, %c0_2] : memref<128x128xbf16, #tpu.memory_space<vmem>>, vector<128x128xbf16>
    %cst = arith.constant dense<0.000000e+00> : vector<128x128xf32>
    %2 = tpu.matmul %0, %1, %cst {dimension_numbers = #tpu.dot_dimension_numbers<[1], [0], [0], [1], [0, 0, 1, 1], [], []>} : vector<128x128xbf16>, vector<128x128xbf16>, vector<128x128xf32> -> vector<128x128xf32>
    %3 = arith.truncf %2 : vector<128x128xf32> to vector<128x128xbf16>
    %c0_3 = arith.constant 0 : index
    %c0_4 = arith.constant 0 : index
    %4 = vector.load %arg3[%c0_3, %c0_4] : memref<128x128xbf16, #tpu.memory_space<vmem>>, vector<128x128xbf16>
    tpu.vector_store %arg3[%c0_3, %c0_4], %3 {strides = array<i32>} : memref<128x128xbf16, #tpu.memory_space<vmem>>, vector<128x128xbf16>,
    %cst_5 = arith.constant dense<0.000000e+00> : vector<128xf32>
    %5 = vector.multi_reduction <add>, %2, %cst_5 [0] : vector<128x128xf32> to vector<128xf32>
    %6 = vector.shape_cast %5 : vector<128xf32> to vector<1x128xf32>
    %7 = arith.mulf %2, %2 : vector<128x128xf32>
    %cst_6 = arith.constant dense<0.000000e+00> : vector<128xf32>
    %8 = vector.multi_reduction <add>, %7, %cst_6 [0] : vector<128x128xf32> to vector<128xf32>
    %9 = vector.shape_cast %8 : vector<128xf32> to vector<1x128xf32>
    %cst_7 = arith.constant 0.000000e+00 : f32
    %10 = vector.broadcast %cst_7 : f32 to vector<6x128xf32>
    %11 = tpu.concatenate %6, %9, %10 in 0 : vector<1x128xf32>, vector<1x128xf32>, vector<6x128xf32> -> vector<8x128xf32>
    %c0_8 = arith.constant 0 : index
    %c0_9 = arith.constant 0 : index
    %12 = vector.load %arg4[%c0_8, %c0_9] : memref<8x128xf32, #tpu.memory_space<vmem>>, vector<8x128xf32>
    tpu.vector_store %arg4[%c0_8, %c0_9], %11 {strides = array<i32>} : memref<8x128xf32, #tpu.memory_space<vmem>>, vector<8x128xf32>,
    return
  }
  func.func @transform_0(%arg0: i32) -> (i32, i32) {
    %c0_i32 = arith.constant 0 : i32
    %c0_i32_0 = arith.constant 0 : i32
    return %arg0, %c0_i32 : i32, i32
  }
  func.func @transform_1(%arg0: i32) -> (i32, i32) {
    %c0_i32 = arith.constant 0 : i32
    %c0_i32_0 = arith.constant 0 : i32
    %c0_i32_1 = arith.constant 0 : i32
    return %c0_i32, %c0_i32_0 : i32, i32
  }
  func.func @transform_2(%arg0: i32) -> (i32, i32) {
    %c0_i32 = arith.constant 0 : i32
    %c0_i32_0 = arith.constant 0 : i32
    return %arg0, %c0_i32 : i32, i32
  }
  func.func @transform_3(%arg0: i32) -> (i32, i32) {
    %c0_i32 = arith.constant 0 : i32
    %c0_i32_0 = arith.constant 0 : i32
    return %arg0, %c0_i32 : i32, i32
  }
}

module attributes {stable_mosaic.version = 11 : i64} {
  func.func @_matmul_stats_kernel(%arg0: i32, %arg1: memref<32x128xbf16, #tpu.memory_space<vmem>>, %arg2: memref<128x128xbf16, #tpu.memory_space<vmem>>, %arg3: memref<32x128xbf16, #tpu.memory_space<vmem>>, %arg4: memref<8x128xf32, #tpu.memory_space<vmem>>) attributes {dimension_semantics = [#tpu.dimension_semantics<parallel>], iteration_bounds = array<i64: 1>, scalar_prefetch = 0 : i64, scratch_operands = 0 : i64, tpu.core_type = #tpu.core_type<tc>, window_params = [{transform_indices = @transform_0, window_bounds = array<i64: 32, 128>}, {pipeline_mode = #tpu.pipeline_mode<synchronous>, transform_indices = @transform_1, window_bounds = array<i64: 128, 128>}, {transform_indices = @transform_2, window_bounds = array<i64: 32, 128>}, {transform_indices = @transform_3, window_bounds = array<i64: 8, 128>}]} {
    %c0 = arith.constant 0 : index
    %c0_0 = arith.constant 0 : index
    %0 = vector.load %arg1[%c0, %c0_0] : memref<32x128xbf16, #tpu.memory_space<vmem>>, vector<32x128xbf16>
    %c0_1 = arith.constant 0 : index
    %c0_2 = arith.constant 0 : index
    %1 = vector.load %arg2[%c0_1, %c0_2] : memref<128x128xbf16, #tpu.memory_space<vmem>>, vector<128x128xbf16>
    %cst = arith.constant dense<0.000000e+00> : vector<32x128xf32>
    %2 = tpu.matmul %0, %1, %cst {dimension_numbers = #tpu.dot_dimension_numbers<[1], [0], [0], [1], [0, 0, 1, 1], [], []>} : vector<32x128xbf16>, vector<128x128xbf16>, vector<32x128xf32> -> vector<32x128xf32>
    %3 = arith.truncf %2 : vector<32x128xf32> to vector<32x128xbf16>
    %c0_3 = arith.constant 0 : index
    %c0_4 = arith.constant 0 : index
    %4 = vector.load %arg3[%c0_3, %c0_4] : memref<32x128xbf16, #tpu.memory_space<vmem>>, vector<32x128xbf16>
    tpu.vector_store %arg3[%c0_3, %c0_4], %3 {strides = array<i32>} : memref<32x128xbf16, #tpu.memory_space<vmem>>, vector<32x128xbf16>,
    %cst_5 = arith.constant dense<0.000000e+00> : vector<128xf32>
    %5 = vector.multi_reduction <add>, %2, %cst_5 [0] : vector<32x128xf32> to vector<128xf32>
    %6 = vector.shape_cast %5 : vector<128xf32> to vector<1x128xf32>
    %7 = arith.mulf %2, %2 : vector<32x128xf32>
    %cst_6 = arith.constant dense<0.000000e+00> : vector<128xf32>
    %8 = vector.multi_reduction <add>, %7, %cst_6 [0] : vector<32x128xf32> to vector<128xf32>
    %9 = vector.shape_cast %8 : vector<128xf32> to vector<1x128xf32>
    %cst_7 = arith.constant 0.000000e+00 : f32
    %10 = vector.broadcast %cst_7 : f32 to vector<6x128xf32>
    %11 = tpu.concatenate %6, %9, %10 in 0 : vector<1x128xf32>, vector<1x128xf32>, vector<6x128xf32> -> vector<8x128xf32>
    %c0_8 = arith.constant 0 : index
    %c0_9 = arith.constant 0 : index
    %12 = vector.load %arg4[%c0_8, %c0_9] : memref<8x128xf32, #tpu.memory_space<vmem>>, vector<8x128xf32>
    tpu.vector_store %arg4[%c0_8, %c0_9], %11 {strides = array<i32>} : memref<8x128xf32, #tpu.memory_space<vmem>>, vector<8x128xf32>,
    return
  }
  func.func @transform_0(%arg0: i32) -> (i32, i32) {
    %c0_i32 = arith.constant 0 : i32
    %c0_i32_0 = arith.constant 0 : i32
    return %arg0, %c0_i32 : i32, i32
  }
  func.func @transform_1(%arg0: i32) -> (i32, i32) {
    %c0_i32 = arith.constant 0 : i32
    %c0_i32_0 = arith.constant 0 : i32
    %c0_i32_1 = arith.constant 0 : i32
    return %c0_i32, %c0_i32_0 : i32, i32
  }
  func.func @transform_2(%arg0: i32) -> (i32, i32) {
    %c0_i32 = arith.constant 0 : i32
    %c0_i32_0 = arith.constant 0 : i32
    return %arg0, %c0_i32 : i32, i32
  }
  func.func @transform_3(%arg0: i32) -> (i32, i32) {
    %c0_i32 = arith.constant 0 : i32
    %c0_i32_0 = arith.constant 0 : i32
    return %arg0, %c0_i32 : i32, i32
  }
}

module attributes {stable_mosaic.version = 11 : i64} {
  func.func @_bn_apply_kernel(%arg0: i32, %arg1: memref<32x128xbf16, #tpu.memory_space<vmem>>, %arg2: memref<1x128xf32, #tpu.memory_space<vmem>>, %arg3: memref<1x128xf32, #tpu.memory_space<vmem>>, %arg4: memref<32x128xbf16, #tpu.memory_space<vmem>>) attributes {dimension_semantics = [#tpu.dimension_semantics<parallel>], iteration_bounds = array<i64: 1>, scalar_prefetch = 0 : i64, scratch_operands = 0 : i64, tpu.core_type = #tpu.core_type<tc>, window_params = [{transform_indices = @transform_0, window_bounds = array<i64: 32, 128>}, {pipeline_mode = #tpu.pipeline_mode<synchronous>, transform_indices = @transform_1, window_bounds = array<i64: 1, 128>}, {pipeline_mode = #tpu.pipeline_mode<synchronous>, transform_indices = @transform_2, window_bounds = array<i64: 1, 128>}, {transform_indices = @transform_3, window_bounds = array<i64: 32, 128>}]} {
    %c0 = arith.constant 0 : index
    %c0_0 = arith.constant 0 : index
    %0 = vector.load %arg1[%c0, %c0_0] : memref<32x128xbf16, #tpu.memory_space<vmem>>, vector<32x128xbf16>
    %1 = arith.extf %0 : vector<32x128xbf16> to vector<32x128xf32>
    %c0_1 = arith.constant 0 : index
    %c0_2 = arith.constant 0 : index
    %2 = vector.load %arg2[%c0_1, %c0_2] : memref<1x128xf32, #tpu.memory_space<vmem>>, vector<1x128xf32>
    %3 = vector.broadcast %2 : vector<1x128xf32> to vector<32x128xf32>
    %4 = arith.mulf %1, %3 : vector<32x128xf32>
    %c0_3 = arith.constant 0 : index
    %c0_4 = arith.constant 0 : index
    %5 = vector.load %arg3[%c0_3, %c0_4] : memref<1x128xf32, #tpu.memory_space<vmem>>, vector<1x128xf32>
    %6 = vector.broadcast %5 : vector<1x128xf32> to vector<32x128xf32>
    %7 = arith.addf %4, %6 : vector<32x128xf32>
    %cst = arith.constant 0.000000e+00 : f32
    %8 = vector.broadcast %cst : f32 to vector<32x128xf32>
    %9 = arith.maximumf %7, %8 : vector<32x128xf32>
    %10 = arith.truncf %9 : vector<32x128xf32> to vector<32x128xbf16>
    %c0_5 = arith.constant 0 : index
    %c0_6 = arith.constant 0 : index
    %11 = vector.load %arg4[%c0_5, %c0_6] : memref<32x128xbf16, #tpu.memory_space<vmem>>, vector<32x128xbf16>
    tpu.vector_store %arg4[%c0_5, %c0_6], %10 {strides = array<i32>} : memref<32x128xbf16, #tpu.memory_space<vmem>>, vector<32x128xbf16>,
    return
  }
  func.func @transform_0(%arg0: i32) -> (i32, i32) {
    %c0_i32 = arith.constant 0 : i32
    %c0_i32_0 = arith.constant 0 : i32
    return %arg0, %c0_i32 : i32, i32
  }
  func.func @transform_1(%arg0: i32) -> (i32, i32) {
    %c0_i32 = arith.constant 0 : i32
    %c0_i32_0 = arith.constant 0 : i32
    %c0_i32_1 = arith.constant 0 : i32
    return %c0_i32, %c0_i32_0 : i32, i32
  }
  func.func @transform_2(%arg0: i32) -> (i32, i32) {
    %c0_i32 = arith.constant 0 : i32
    %c0_i32_0 = arith.constant 0 : i32
    %c0_i32_1 = arith.constant 0 : i32
    return %c0_i32, %c0_i32_0 : i32, i32
  }
  func.func @transform_3(%arg0: i32) -> (i32, i32) {
    %c0_i32 = arith.constant 0 : i32
    %c0_i32_0 = arith.constant 0 : i32
    return %arg0, %c0_i32 : i32, i32
  }
}

module attributes {stable_mosaic.version = 11 : i64} {
  func.func @_bn_apply_kernel(%arg0: i32, %arg1: memref<32x128xbf16, #tpu.memory_space<vmem>>, %arg2: memref<1x128xf32, #tpu.memory_space<vmem>>, %arg3: memref<1x128xf32, #tpu.memory_space<vmem>>, %arg4: memref<32x128xbf16, #tpu.memory_space<vmem>>, %arg5: memref<32x128xbf16, #tpu.memory_space<vmem>>) attributes {dimension_semantics = [#tpu.dimension_semantics<parallel>], iteration_bounds = array<i64: 1>, scalar_prefetch = 0 : i64, scratch_operands = 0 : i64, tpu.core_type = #tpu.core_type<tc>, window_params = [{transform_indices = @transform_0, window_bounds = array<i64: 32, 128>}, {pipeline_mode = #tpu.pipeline_mode<synchronous>, transform_indices = @transform_1, window_bounds = array<i64: 1, 128>}, {pipeline_mode = #tpu.pipeline_mode<synchronous>, transform_indices = @transform_2, window_bounds = array<i64: 1, 128>}, {transform_indices = @transform_3, window_bounds = array<i64: 32, 128>}, {transform_indices = @transform_4, window_bounds = array<i64: 32, 128>}]} {
    %c0 = arith.constant 0 : index
    %c0_0 = arith.constant 0 : index
    %0 = vector.load %arg1[%c0, %c0_0] : memref<32x128xbf16, #tpu.memory_space<vmem>>, vector<32x128xbf16>
    %1 = arith.extf %0 : vector<32x128xbf16> to vector<32x128xf32>
    %c0_1 = arith.constant 0 : index
    %c0_2 = arith.constant 0 : index
    %2 = vector.load %arg2[%c0_1, %c0_2] : memref<1x128xf32, #tpu.memory_space<vmem>>, vector<1x128xf32>
    %3 = vector.broadcast %2 : vector<1x128xf32> to vector<32x128xf32>
    %4 = arith.mulf %1, %3 : vector<32x128xf32>
    %c0_3 = arith.constant 0 : index
    %c0_4 = arith.constant 0 : index
    %5 = vector.load %arg3[%c0_3, %c0_4] : memref<1x128xf32, #tpu.memory_space<vmem>>, vector<1x128xf32>
    %6 = vector.broadcast %5 : vector<1x128xf32> to vector<32x128xf32>
    %7 = arith.addf %4, %6 : vector<32x128xf32>
    %c0_5 = arith.constant 0 : index
    %c0_6 = arith.constant 0 : index
    %8 = vector.load %arg4[%c0_5, %c0_6] : memref<32x128xbf16, #tpu.memory_space<vmem>>, vector<32x128xbf16>
    %9 = arith.extf %8 : vector<32x128xbf16> to vector<32x128xf32>
    %10 = arith.addf %7, %9 : vector<32x128xf32>
    %cst = arith.constant 0.000000e+00 : f32
    %11 = vector.broadcast %cst : f32 to vector<32x128xf32>
    %12 = arith.maximumf %10, %11 : vector<32x128xf32>
    %13 = arith.truncf %12 : vector<32x128xf32> to vector<32x128xbf16>
    %c0_7 = arith.constant 0 : index
    %c0_8 = arith.constant 0 : index
    %14 = vector.load %arg5[%c0_7, %c0_8] : memref<32x128xbf16, #tpu.memory_space<vmem>>, vector<32x128xbf16>
    tpu.vector_store %arg5[%c0_7, %c0_8], %13 {strides = array<i32>} : memref<32x128xbf16, #tpu.memory_space<vmem>>, vector<32x128xbf16>,
    return
  }
  func.func @transform_0(%arg0: i32) -> (i32, i32) {
    %c0_i32 = arith.constant 0 : i32
    %c0_i32_0 = arith.constant 0 : i32
    return %arg0, %c0_i32 : i32, i32
  }
  func.func @transform_1(%arg0: i32) -> (i32, i32) {
    %c0_i32 = arith.constant 0 : i32
    %c0_i32_0 = arith.constant 0 : i32
    %c0_i32_1 = arith.constant 0 : i32
    return %c0_i32, %c0_i32_0 : i32, i32
  }
  func.func @transform_2(%arg0: i32) -> (i32, i32) {
    %c0_i32 = arith.constant 0 : i32
    %c0_i32_0 = arith.constant 0 : i32
    %c0_i32_1 = arith.constant 0 : i32
    return %c0_i32, %c0_i32_0 : i32, i32
  }
  func.func @transform_3(%arg0: i32) -> (i32, i32) {
    %c0_i32 = arith.constant 0 : i32
    %c0_i32_0 = arith.constant 0 : i32
    return %arg0, %c0_i32 : i32, i32
  }
  func.func @transform_4(%arg0: i32) -> (i32, i32) {
    %c0_i32 = arith.constant 0 : i32
    %c0_i32_0 = arith.constant 0 : i32
    return %arg0, %c0_i32 : i32, i32
  }
}

module attributes {stable_mosaic.version = 11 : i64} {
  func.func @_bn_apply_kernel(%arg0: i32, %arg1: memref<128x128xbf16, #tpu.memory_space<vmem>>, %arg2: memref<1x128xf32, #tpu.memory_space<vmem>>, %arg3: memref<1x128xf32, #tpu.memory_space<vmem>>, %arg4: memref<128x128xf32, #tpu.memory_space<vmem>>) attributes {dimension_semantics = [#tpu.dimension_semantics<parallel>], iteration_bounds = array<i64: 1>, scalar_prefetch = 0 : i64, scratch_operands = 0 : i64, tpu.core_type = #tpu.core_type<tc>, window_params = [{transform_indices = @transform_0, window_bounds = array<i64: 128, 128>}, {pipeline_mode = #tpu.pipeline_mode<synchronous>, transform_indices = @transform_1, window_bounds = array<i64: 1, 128>}, {pipeline_mode = #tpu.pipeline_mode<synchronous>, transform_indices = @transform_2, window_bounds = array<i64: 1, 128>}, {transform_indices = @transform_3, window_bounds = array<i64: 128, 128>}]} {
    %c0 = arith.constant 0 : index
    %c0_0 = arith.constant 0 : index
    %0 = vector.load %arg1[%c0, %c0_0] : memref<128x128xbf16, #tpu.memory_space<vmem>>, vector<128x128xbf16>
    %1 = arith.extf %0 : vector<128x128xbf16> to vector<128x128xf32>
    %c0_1 = arith.constant 0 : index
    %c0_2 = arith.constant 0 : index
    %2 = vector.load %arg2[%c0_1, %c0_2] : memref<1x128xf32, #tpu.memory_space<vmem>>, vector<1x128xf32>
    %3 = vector.broadcast %2 : vector<1x128xf32> to vector<128x128xf32>
    %4 = arith.mulf %1, %3 : vector<128x128xf32>
    %c0_3 = arith.constant 0 : index
    %c0_4 = arith.constant 0 : index
    %5 = vector.load %arg3[%c0_3, %c0_4] : memref<1x128xf32, #tpu.memory_space<vmem>>, vector<1x128xf32>
    %6 = vector.broadcast %5 : vector<1x128xf32> to vector<128x128xf32>
    %7 = arith.addf %4, %6 : vector<128x128xf32>
    %c0_5 = arith.constant 0 : index
    %c0_6 = arith.constant 0 : index
    %8 = vector.load %arg4[%c0_5, %c0_6] : memref<128x128xf32, #tpu.memory_space<vmem>>, vector<128x128xf32>
    tpu.vector_store %arg4[%c0_5, %c0_6], %7 {strides = array<i32>} : memref<128x128xf32, #tpu.memory_space<vmem>>, vector<128x128xf32>,
    return
  }
  func.func @transform_0(%arg0: i32) -> (i32, i32) {
    %c0_i32 = arith.constant 0 : i32
    %c0_i32_0 = arith.constant 0 : i32
    return %arg0, %c0_i32 : i32, i32
  }
  func.func @transform_1(%arg0: i32) -> (i32, i32) {
    %c0_i32 = arith.constant 0 : i32
    %c0_i32_0 = arith.constant 0 : i32
    %c0_i32_1 = arith.constant 0 : i32
    return %c0_i32, %c0_i32_0 : i32, i32
  }
  func.func @transform_2(%arg0: i32) -> (i32, i32) {
    %c0_i32 = arith.constant 0 : i32
    %c0_i32_0 = arith.constant 0 : i32
    %c0_i32_1 = arith.constant 0 : i32
    return %c0_i32, %c0_i32_0 : i32, i32
  }
  func.func @transform_3(%arg0: i32) -> (i32, i32) {
    %c0_i32 = arith.constant 0 : i32
    %c0_i32_0 = arith.constant 0 : i32
    return %arg0, %c0_i32 : i32, i32
  }
}

</mosaic_0001>

<bundles_post_ra>
// kernel: _hourglass_forward.13
= control target key start
LH: loop header
LB: loop body
LE: loop exit
PB: predicated region body
PF: predicated region fallthrough
CT: control target
= control target key end

     0   :  { %s422_s0 = inlined_call_operand.vmem [shape: bf16[128,128], index: 0, kind: input, shape index: {}]   ;;  %s423_s1 = inlined_call_operand.vmem [shape: f32[1,128], index: 1, kind: input, shape index: {}]   ;;  %s424_s2 = inlined_call_operand.vmem [shape: f32[1,128], index: 2, kind: input, shape index: {}]   ;;  %s425_s3 = inlined_call_operand.vmem [shape: bf16[128,128], index: 3, kind: output, shape index: {}]  }
   0x1   :  { %v227_v0 = vld [vmem:[%s422_s0] sm:$0xff]   ;;  %v298_v4 = vld [vmem:[%s422_s0 + $0x8] sm:$0xff]   ;;  %v299_v5 = vld [vmem:[%s422_s0 + $0x10] sm:$0xff]  }
   0x2   :  { %v338_v1 = vld [vmem:[%s423_s1] ss:$0 sm:$0xff]  ;;  %v228_v2 = vunpack.c.l.bf16 %v227_v0  ;;  %v229_v3 = vunpack.c.h.bf16 %v227_v0  ;;  %v300_v6 = vld [vmem:[%s422_s0 + $0x18] sm:$0xff]   ;;  %v232_v8 = vunpack.c.l.bf16 %v298_v4  ;;  %v233_v9 = vunpack.c.h.bf16 %v298_v4  ;;  %v302_v33 = vld [vmem:[%s422_s0 + $0x28] sm:$0xff]  }
   0x3   :  { %v352_v7 = vld [vmem:[%s424_s2] ss:$0 sm:$0xff]  ;;  %v236_v10 = vunpack.c.l.bf16 %v299_v5  ;;  %v237_v11 = vunpack.c.h.bf16 %v299_v5  ;;  %v240_v14 = vunpack.c.l.bf16 %v300_v6  ;;  %v241_v15 = vunpack.c.h.bf16 %v300_v6  ;;  %v303_v38 = vld [vmem:[%s422_s0 + $0x30] sm:$0xff]   ;;  %v304_v43 = vld [vmem:[%s422_s0 + $0x38] sm:$0xff]  }
   0x4   :  { %v53_v12 = vmul.f32 %v228_v2, %v338_v1  ;;  %v54_v13 = vmul.f32 %v229_v3, %v338_v1  ;;  %v55_v16 = vmul.f32 %v232_v8, %v338_v1  ;;  %v56_v17 = vmul.f32 %v233_v9, %v338_v1  ;;  %v301_v28 = vld [vmem:[%s422_s0 + $0x20] sm:$0xff]  }
   0x5   :  { %v57_v18 = vmul.f32 %v236_v10, %v338_v1  ;;  %v58_v19 = vmul.f32 %v237_v11, %v338_v1  ;;  %v59_v22 = vmul.f32 %v240_v14, %v338_v1  ;;  %v60_v23 = vmul.f32 %v241_v15, %v338_v1 }
   0x6   :  { %v76_v20 = vadd.f32 %v352_v7, %v53_v12  ;;  %v77_v21 = vadd.f32 %v352_v7, %v54_v13  ;;  %v78_v24 = vadd.f32 %v352_v7, %v55_v16  ;;  %v79_v25 = vadd.f32 %v352_v7, %v56_v17 }
   0x7   :  { %v80_v26 = vadd.f32 %v352_v7, %v57_v18  ;;  %v81_v27 = vadd.f32 %v352_v7, %v58_v19  ;;  %v82_v31 = vadd.f32 %v352_v7, %v59_v22  ;;  %v83_v32 = vadd.f32 %v352_v7, %v60_v23 }
   0x8   :  { %v92_v29 = vmax.f32 %v76_v20, 0.0  ;;  %v93_v30 = vmax.f32 %v77_v21, 0.0  ;;  %v94_v34 = vmax.f32 %v78_v24, 0.0  ;;  %v95_v35 = vmax.f32 %v79_v25, 0.0 }
   0x9   :  { %v96_v36 = vmax.f32 %v80_v26, 0.0  ;;  %v97_v37 = vmax.f32 %v81_v27, 0.0  ;;  %v98_v40 = vmax.f32 %v82_v31, 0.0  ;;  %v99_v41 = vmax.f32 %v83_v32, 0.0 }
   0xa   :  { %v261_v39 = vpack.c.bf16 %v93_v30, %v92_v29  ;;  %v244_v42 = vunpack.c.l.bf16 %v301_v28  ;;  %v266_v44 = vpack.c.bf16 %v95_v35, %v94_v34  ;;  %v245_v46 = vunpack.c.h.bf16 %v301_v28 }
   0xb   :  { %v271_v45 = vpack.c.bf16 %v97_v37, %v96_v36  ;;  %v248_v47 = vunpack.c.l.bf16 %v302_v33  ;;  %v276_v48 = vpack.c.bf16 %v99_v41, %v98_v40  ;;  %v249_v50 = vunpack.c.h.bf16 %v302_v33 }
   0xc   :  { %262 = vst [vmem:[%s425_s3] sm:$0xff] %v261_v39   ;;  %v61_v49 = vmul.f32 %v244_v42, %v338_v1  ;;  %v252_v51 = vunpack.c.l.bf16 %v303_v38  ;;  %305 = vst [vmem:[%s425_s3 + $0x8] sm:$0xff] %v266_v44   ;;  %v62_v52 = vmul.f32 %v245_v46, %v338_v1  ;;  %v253_v54 = vunpack.c.h.bf16 %v303_v38 }
   0xd   :  { %306 = vst [vmem:[%s425_s3 + $0x10] sm:$0xff] %v271_v45   ;;  %v63_v53 = vmul.f32 %v248_v47, %v338_v1  ;;  %v256_v55 = vunpack.c.l.bf16 %v304_v43  ;;  %307 = vst [vmem:[%s425_s3 + $0x18] sm:$0xff] %v276_v48   ;;  %v64_v57 = vmul.f32 %v249_v50, %v338_v1  ;;  %v257_v59 = vunpack.c.h.bf16 %v304_v43 }
   0xe   :  { %v84_v56 = vadd.f32 %v352_v7, %v61_v49  ;;  %v65_v58 = vmul.f32 %v252_v51, %v338_v1  ;;  %v85_v60 = vadd.f32 %v352_v7, %v62_v52  ;;  %v66_v62 = vmul.f32 %v253_v54, %v338_v1 }
   0xf   :  { %v86_v61 = vadd.f32 %v352_v7, %v63_v53  ;;  %v67_v63 = vmul.f32 %v256_v55, %v338_v1  ;;  %v87_v2 = vadd.f32 %v352_v7, %v64_v57  ;;  %v68_v4 = vmul.f32 %v257_v59, %v338_v1 }
  0x10   :  { %v100_v0 = vmax.f32 %v84_v56, 0.0  ;;  %v88_v3 = vadd.f32 %v352_v7, %v65_v58  ;;  %v101_v5 = vmax.f32 %v85_v60, 0.0  ;;  %v89_v8 = vadd.f32 %v352_v7, %v66_v62 }
  0x11   :  { %v102_v6 = vmax.f32 %v86_v61, 0.0  ;;  %v90_v9 = vadd.f32 %v352_v7, %v67_v63  ;;  %v103_v10 = vmax.f32 %v87_v2, 0.0  ;;  %v91_v12 = vadd.f32 %v352_v7, %v68_v4 }
  0x12   :  { %v104_v11 = vmax.f32 %v88_v3, 0.0  ;;  %v281_v13 = vpack.c.bf16 %v101_v5, %v100_v0  ;;  %v105_v14 = vmax.f32 %v89_v8, 0.0 }
  0x13   :  { %v106_v15 = vmax.f32 %v90_v9, 0.0  ;;  %v286_v16 = vpack.c.bf16 %v103_v10, %v102_v6  ;;  %v107_v17 = vmax.f32 %v91_v12, 0.0 }
  0x14   :  { %308 = vst [vmem:[%s425_s3 + $0x20] sm:$0xff] %v281_v13   ;;  %v291_v1 = vpack.c.bf16 %v105_v14, %v104_v11 }
  0x15   :  { %309 = vst [vmem:[%s425_s3 + $0x28] sm:$0xff] %v286_v16   ;;  %v296_v18 = vpack.c.bf16 %v107_v17, %v106_v15 }
  0x16   :  { %310 = vst [vmem:[%s425_s3 + $0x30] sm:$0xff] %v291_v1  }
  0x17   :  { %311 = vst [vmem:[%s425_s3 + $0x38] sm:$0xff] %v296_v18  }

// kernel: _hourglass_forward.12
= control target key start
LH: loop header
LB: loop body
LE: loop exit
PB: predicated region body
PF: predicated region fallthrough
CT: control target
= control target key end

     0   :  { %vm377_vm0 = vcmask 1040384   ;;  %vm379_vm1 = vcmask 1041408   ;;  %s660_s1 = inlined_call_operand.vmem [shape: bf16[128,128], index: 1, kind: input, shape index: {}]   ;;  %s661_s0 = inlined_call_operand.vmem [shape: bf16[128,128], index: 0, kind: input, shape index: {}]   ;;  %s662_s2 = inlined_call_operand.vmem [shape: bf16[128,128], index: 2, kind: output, shape index: {0}]   ;;  %s663_s3 = inlined_call_operand.vmem [shape: f32[8,128], index: 3, kind: output, shape index: {1}]  }
   0x1   :  { %v549_v0 = vld [vmem:[%s660_s1] sm:$0xff]   ;;  %v550_v1 = vld [vmem:[%s660_s1 + $0x8] sm:$0xff]   ;;  %v551_v2 = vld [vmem:[%s660_s1 + $0x10] sm:$0xff]  }
   0x2   :  { %501 = vmatprep.subr.bf16.mxu0 %v549_v0  ;;  %533 = vmatprep.subr.bf16.mxu1 %v549_v0  ;;  %v552_v3 = vld [vmem:[%s660_s1 + $0x18] sm:$0xff]   ;;  %v557_v4 = vld [vmem:[%s661_s0] sm:$0xff]   ;;  %v554_v7 = vld [vmem:[%s660_s1 + $0x28] sm:$0xff]  }
   0x3   :  { %502 = vmatpush3.bf16.msra.mxu0 %v549_v0  ;;  %541 = vmatpush3.bf16.msra.mxu1 %v549_v0  ;;  %v553_v5 = vld [vmem:[%s660_s1 + $0x20] sm:$0xff]   ;;  %v555_v8 = vld [vmem:[%s660_s1 + $0x30] sm:$0xff]   ;;  %v556_v9 = vld [vmem:[%s660_s1 + $0x38] sm:$0xff]  }
   0x4   :  { %503 = vmatprep.subr.bf16.mxu0 %v550_v1  ;;  %534 = vmatprep.subr.bf16.mxu1 %v550_v1  ;;  %v561_v6 = vld [vmem:[%s661_s0 + $0x20] sm:$0xff]   ;;  %v558_v10 = vld [vmem:[%s661_s0 + $0x8] sm:$0xff]   ;;  %v559_v12 = vld [vmem:[%s661_s0 + $0x10] sm:$0xff]  }
   0x5   :  { %517 = vmatprep.mubr.bf16.mxu0 %v557_v4  ;;  %525 = vmatprep.mubr.bf16.mxu1 %v561_v6  ;;  %v562_v11 = vld [vmem:[%s661_s0 + $0x28] sm:$0xff]   ;;  %v563_v13 = vld [vmem:[%s661_s0 + $0x30] sm:$0xff]   ;;  %v560_v14 = vld [vmem:[%s661_s0 + $0x18] sm:$0xff]  }
   0x6   :  { %v564_v15 = vld [vmem:[%s661_s0 + $0x38] sm:$0xff]  }
   0x7   :  { %504 = vmatpush3.bf16.msra.mxu0 %v550_v1  ;;  %542 = vmatpush3.bf16.msra.mxu1 %v550_v1 }
   0x8   :  { %505 = vmatprep.subr.bf16.mxu0 %v551_v2  ;;  %535 = vmatprep.subr.bf16.mxu1 %v551_v2 }
   0xb   :  { %506 = vmatpush3.bf16.msra.mxu0 %v551_v2  ;;  %543 = vmatpush3.bf16.msra.mxu1 %v551_v2 }
   0xc   :  { %507 = vmatprep.subr.bf16.mxu0 %v552_v3  ;;  %536 = vmatprep.subr.bf16.mxu1 %v552_v3 }
   0xf   :  { %508 = vmatpush3.bf16.msra.mxu0 %v552_v3  ;;  %544 = vmatpush3.bf16.msra.mxu1 %v552_v3 }
  0x10   :  { %509 = vmatprep.subr.bf16.mxu0 %v553_v5  ;;  %537 = vmatprep.subr.bf16.mxu1 %v553_v5 }
  0x13   :  { %510 = vmatpush3.bf16.msra.mxu0 %v553_v5  ;;  %545 = vmatpush3.bf16.msra.mxu1 %v553_v5 }
  0x14   :  { %511 = vmatprep.subr.bf16.mxu0 %v554_v7  ;;  %538 = vmatprep.subr.bf16.mxu1 %v554_v7 }
  0x17   :  { %512 = vmatpush3.bf16.msra.mxu0 %v554_v7  ;;  %546 = vmatpush3.bf16.msra.mxu1 %v554_v7 }
  0x18   :  { %513 = vmatprep.subr.bf16.mxu0 %v555_v8  ;;  %539 = vmatprep.subr.bf16.mxu1 %v555_v8 }
  0x1b   :  { %514 = vmatpush3.bf16.msra.mxu0 %v555_v8  ;;  %547 = vmatpush3.bf16.msra.mxu1 %v555_v8 }
  0x1c   :  { %515 = vmatprep.subr.bf16.mxu0 %v556_v9  ;;  %540 = vmatprep.subr.bf16.mxu1 %v556_v9 }
  0x1f   :  { %516 = vmatpush3.bf16.msra.mxu0 %v556_v9  ;;  %548 = vmatpush3.bf16.msra.mxu1 %v556_v9 }
  0x22   :  { %518 = vmatmul.mubr.bf16.vlgmr.msra.gmra.mrb[0].mxu0 %v558_v10  ;;  %526 = vmatmul.mubr.bf16.vlgmr.msra.gmra.mrb[0].mxu1 %v562_v11 }
  0x23   :  { %521 = vmatprep.mubr.bf16.mxu0 %v559_v12  ;;  %529 = vmatprep.mubr.bf16.mxu1 %v563_v13 }
  0x2a   :  { %522 = vmatmul.mubr.bf16.gmra.mrb[4].mxu0 %v560_v14  ;;  %530 = vmatmul.mubr.bf16.gmra.mrb[4].mxu1 %v564_v15 }
  0xf5   :  { %v519_v16 = vpop.f32.mrb[0].mxu0  ;;  %v527_v17 = vpop.f32.mrb[0].mxu1 }
  0xf6   :  { %v176_v18 = vpop.f32.mrb[1].mxu0  ;;  %v208_v19 = vpop.f32.mrb[1].mxu1  ;;  %v342_v31 = vmul.f32 %v519_v16, %v519_v16  ;;  %v350_v3 = vmul.f32 %v527_v17, %v527_v17 }
  0xf7   :  { %v520_v20 = vpop.f32.mrb[2].mxu0  ;;  %v528_v21 = vpop.f32.mrb[2].mxu1  ;;  %v340_v22 = vmul.f32 %v176_v18, %v176_v18  ;;  %v348_v61 = vmul.f32 %v208_v19, %v208_v19 }
  0xf8   :  { %v446_v23 = vpack.c.bf16 %v520_v20, %v519_v16  ;;  %v179_v24 = vpop.f32.mrb[3].mxu0  ;;  %v466_v25 = vpack.c.bf16 %v528_v21, %v527_v17  ;;  %v211_v26 = vpop.f32.mrb[3].mxu1  ;;  %v343_v34 = vmul.f32 %v520_v20, %v520_v20  ;;  %v351_v6 = vmul.f32 %v528_v21, %v528_v21 }
  0xf9   :  { %v441_v27 = vpack.c.bf16 %v179_v24, %v176_v18  ;;  %v319_v28 = vadd.f32 %v179_v24, %v176_v18  ;;  %v341_v29 = vmul.f32 %v179_v24, %v179_v24  ;;  %v461_v30 = vpack.c.bf16 %v211_v26, %v208_v19 }
  0xfa   :  { %478 = vst [vmem:[%s662_s2 + $0x8] sm:$0xff] %v446_v23   ;;  %482 = vst [vmem:[%s662_s2 + $0x28] sm:$0xff] %v466_v25   ;;  %v349_v2 = vmul.f32 %v211_v26, %v211_v26 }
  0xfb   :  { %442 = vst [vmem:[%s662_s2] sm:$0xff] %v441_v27   ;;  %v320_v32 = vadd.f32 %v519_v16, %v319_v28  ;;  %v356_v33 = vadd.f32 %v341_v29, %v340_v22  ;;  %481 = vst [vmem:[%s662_s2 + $0x20] sm:$0xff] %v461_v30  }
  0xfd   :  { %v357_v35 = vadd.f32 %v356_v33, %v342_v31  ;;  %v523_v36 = vpop.f32.mrb[4].mxu0  ;;  %v321_v37 = vadd.f32 %v520_v20, %v320_v32  ;;  %v531_v38 = vpop.f32.mrb[4].mxu1 }
  0xfe   :  { %v192_v39 = vpop.f32.mrb[5].mxu0  ;;  %v224_v40 = vpop.f32.mrb[5].mxu1  ;;  %v346_v55 = vmul.f32 %v523_v36, %v523_v36  ;;  %v354_v15 = vmul.f32 %v531_v38, %v531_v38 }
  0xff   :  { %v322_v41 = vadd.f32 %v321_v37, %v192_v39  ;;  %v344_v42 = vmul.f32 %v192_v39, %v192_v39  ;;  %v358_v43 = vadd.f32 %v357_v35, %v343_v34  ;;  %v524_v44 = vpop.f32.mrb[6].mxu0  ;;  %v532_v45 = vpop.f32.mrb[6].mxu1  ;;  %v352_v9 = vmul.f32 %v224_v40, %v224_v40 }
 0x100   :  { %v456_v46 = vpack.c.bf16 %v524_v44, %v523_v36  ;;  %v195_v47 = vpop.f32.mrb[7].mxu0  ;;  %v476_v48 = vpack.c.bf16 %v532_v45, %v531_v38  ;;  %v227_v49 = vpop.f32.mrb[7].mxu1  ;;  %v347_v58 = vmul.f32 %v524_v44, %v524_v44 }
 0x101   :  { %v359_v50 = vadd.f32 %v358_v43, %v344_v42  ;;  %v451_v51 = vpack.c.bf16 %v195_v47, %v192_v39  ;;  %v323_v52 = vadd.f32 %v322_v41, %v195_v47  ;;  %v345_v53 = vmul.f32 %v195_v47, %v195_v47 }
 0x102   :  { %480 = vst [vmem:[%s662_s2 + $0x18] sm:$0xff] %v456_v46   ;;  %484 = vst [vmem:[%s662_s2 + $0x38] sm:$0xff] %v476_v48   ;;  %v471_v54 = vpack.c.bf16 %v227_v49, %v224_v40  ;;  %v353_v14 = vmul.f32 %v227_v49, %v227_v49 }
 0x103   :  { %479 = vst [vmem:[%s662_s2 + $0x10] sm:$0xff] %v451_v51   ;;  %v324_v56 = vadd.f32 %v523_v36, %v323_v52  ;;  %v360_v57 = vadd.f32 %v359_v50, %v345_v53 }
 0x104   :  { %483 = vst [vmem:[%s662_s2 + $0x30] sm:$0xff] %v471_v54  }
 0x105   :  { %v361_v59 = vadd.f32 %v360_v57, %v346_v55  ;;  %v325_v60 = vadd.f32 %v524_v44, %v324_v56 }
 0x107   :  { %v326_v62 = vadd.f32 %v325_v60, %v208_v19  ;;  %v362_v63 = vadd.f32 %v361_v59, %v347_v58  ;;  %v355_v19 = vmul.f32 %v532_v45, %v532_v45 }
 0x109   :  { %v363_v0 = vadd.f32 %v362_v63, %v348_v61  ;;  %v327_v1 = vadd.f32 %v326_v62, %v211_v26 }
 0x10b   :  { %v328_v4 = vadd.f32 %v527_v17, %v327_v1  ;;  %v364_v5 = vadd.f32 %v363_v0, %v349_v2 }
 0x10d   :  { %v365_v7 = vadd.f32 %v364_v5, %v350_v3  ;;  %v329_v8 = vadd.f32 %v528_v21, %v328_v4 }
 0x10f   :  { %v330_v10 = vadd.f32 %v329_v8, %v224_v40  ;;  %v366_v11 = vadd.f32 %v365_v7, %v351_v6 }
 0x111   :  { %v367_v12 = vadd.f32 %v366_v11, %v352_v9  ;;  %v331_v13 = vadd.f32 %v330_v10, %v227_v49 }
 0x113   :  { %v332_v16 = vadd.f32 %v531_v38, %v331_v13  ;;  %v368_v18 = vadd.f32 %v367_v12, %v353_v14 }
 0x115   :  { %v333_v20 = vadd.f32 %v532_v45, %v332_v16  ;;  %v369_v22 = vadd.f32 %v368_v18, %v354_v15 }
 0x117   :  { %v334_v23 = vrot.slane %v333_v20, 4  ;;  %v370_v24 = vadd.f32 %v369_v22, %v355_v19 }
 0x119   :  { %v335_v25 = vadd.f32 %v334_v23, %v333_v20  ;;  %v371_v17 = vrot.slane %v370_v24, 4 }
 0x11b   :  { %v336_v26 = vrot.slane %v335_v25, 2  ;;  %v372_v27 = vadd.f32 %v371_v17, %v370_v24 }
 0x11d   :  { %v337_v28 = vadd.f32 %v336_v26, %v335_v25  ;;  %v373_v21 = vrot.slane %v372_v27, 2 }
 0x11f   :  { %v338_v29 = vrot.slane %v337_v28, 1  ;;  %v374_v30 = vadd.f32 %v373_v21, %v372_v27 }
 0x121   :  { %v375_v31 = vrot.slane %v374_v30, 1  ;;  %v339_v32 = vadd.f32 %v338_v29, %v337_v28 }
 0x123   :  { %v376_v33 = vadd.f32 %v375_v31, %v374_v30 }
 0x125   :  { %v378_v34 = vsel %vm377_vm0, %v339_v32, %v376_v33 }
 0x126   :  { %v380_v35 = vsel %vm379_vm1, %v378_v34, 0.0 }
 0x127   :  { %381 = vst [vmem:[%s663_s3] sm:$0xff] %v380_v35 }

// kernel: _hourglass_forward.16
= control target key start
LH: loop header
LB: loop body
LE: loop exit
PB: predicated region body
PF: predicated region fallthrough
CT: control target
= control target key end

     0   :  { %vm185_vm0 = vcmask 1040384   ;;  %vm187_vm1 = vcmask 1041408   ;;  %s326_s1 = inlined_call_operand.vmem [shape: bf16[128,128], index: 1, kind: input, shape index: {}]   ;;  %s327_s0 = inlined_call_operand.vmem [shape: bf16[32,128], index: 0, kind: input, shape index: {}]   ;;  %s328_s2 = inlined_call_operand.vmem [shape: bf16[32,128], index: 2, kind: output, shape index: {0}]   ;;  %s329_s3 = inlined_call_operand.vmem [shape: f32[8,128], index: 3, kind: output, shape index: {1}]  }
   0x1   :  { %v257_v0 = vld [vmem:[%s326_s1] sm:$0xff]   ;;  %v258_v1 = vld [vmem:[%s326_s1 + $0x8] sm:$0xff]   ;;  %v259_v2 = vld [vmem:[%s326_s1 + $0x10] sm:$0xff]  }
   0x2   :  { %237 = vmatprep.subr.bf16.mxu0 %v257_v0  ;;  %v260_v3 = vld [vmem:[%s326_s1 + $0x18] sm:$0xff]   ;;  %v265_v4 = vld [vmem:[%s327_s0] sm:$0xff]   ;;  %v262_v6 = vld [vmem:[%s326_s1 + $0x28] sm:$0xff]  }
   0x3   :  { %238 = vmatpush3.bf16.msra.mxu0 %v257_v0  ;;  %253 = vmatprep.mubr.bf16.mxu0 %v265_v4  ;;  %v261_v5 = vld [vmem:[%s326_s1 + $0x20] sm:$0xff]   ;;  %v263_v7 = vld [vmem:[%s326_s1 + $0x30] sm:$0xff]   ;;  %v264_v8 = vld [vmem:[%s326_s1 + $0x38] sm:$0xff]  }
   0x4   :  { %239 = vmatprep.subr.bf16.mxu0 %v258_v1  ;;  %v266_v9 = vld [vmem:[%s327_s0 + $0x8] sm:$0xff]  }
   0x7   :  { %240 = vmatpush3.bf16.msra.mxu0 %v258_v1 }
   0x8   :  { %241 = vmatprep.subr.bf16.mxu0 %v259_v2 }
   0xb   :  { %242 = vmatpush3.bf16.msra.mxu0 %v259_v2 }
   0xc   :  { %243 = vmatprep.subr.bf16.mxu0 %v260_v3 }
   0xf   :  { %244 = vmatpush3.bf16.msra.mxu0 %v260_v3 }
  0x10   :  { %245 = vmatprep.subr.bf16.mxu0 %v261_v5 }
  0x13   :  { %246 = vmatpush3.bf16.msra.mxu0 %v261_v5 }
  0x14   :  { %247 = vmatprep.subr.bf16.mxu0 %v262_v6 }
  0x17   :  { %248 = vmatpush3.bf16.msra.mxu0 %v262_v6 }
  0x18   :  { %249 = vmatprep.subr.bf16.mxu0 %v263_v7 }
  0x1b   :  { %250 = vmatpush3.bf16.msra.mxu0 %v263_v7 }
  0x1c   :  { %251 = vmatprep.subr.bf16.mxu0 %v264_v8 }
  0x1f   :  { %252 = vmatpush3.bf16.msra.mxu0 %v264_v8 }
  0x22   :  { %254 = vmatmul.mubr.bf16.vlgmr.msra.gmra.mrb[0].mxu0 %v266_v9 }
  0xf5   :  { %v255_v10 = vpop.f32.mrb[0].mxu0 }
  0xf6   :  { %v128_v11 = vpop.f32.mrb[1].mxu0  ;;  %v174_v19 = vmul.f32 %v255_v10, %v255_v10 }
  0xf7   :  { %v256_v12 = vpop.f32.mrb[2].mxu0  ;;  %v172_v15 = vmul.f32 %v128_v11, %v128_v11 }
  0xf8   :  { %v224_v13 = vpack.c.bf16 %v256_v12, %v255_v10  ;;  %v131_v14 = vpop.f32.mrb[3].mxu0  ;;  %v175_v22 = vmul.f32 %v256_v12, %v256_v12 }
  0xf9   :  { %v219_v16 = vpack.c.bf16 %v131_v14, %v128_v11  ;;  %v163_v17 = vadd.f32 %v131_v14, %v128_v11  ;;  %v173_v18 = vmul.f32 %v131_v14, %v131_v14 }
  0xfa   :  { %226 = vst [vmem:[%s328_s2 + $0x8] sm:$0xff] %v224_v13  }
  0xfb   :  { %220 = vst [vmem:[%s328_s2] sm:$0xff] %v219_v16   ;;  %v164_v20 = vadd.f32 %v255_v10, %v163_v17  ;;  %v176_v21 = vadd.f32 %v173_v18, %v172_v15 }
  0xfd   :  { %v165_v23 = vadd.f32 %v256_v12, %v164_v20  ;;  %v177_v24 = vadd.f32 %v176_v21, %v174_v19 }
  0xff   :  { %v166_v25 = vrot.slane %v165_v23, 4  ;;  %v178_v26 = vadd.f32 %v177_v24, %v175_v22 }
 0x101   :  { %v167_v27 = vadd.f32 %v166_v25, %v165_v23  ;;  %v179_v28 = vrot.slane %v178_v26, 4 }
 0x103   :  { %v168_v29 = vrot.slane %v167_v27, 2  ;;  %v180_v30 = vadd.f32 %v179_v28, %v178_v26 }
 0x105   :  { %v169_v31 = vadd.f32 %v168_v29, %v167_v27  ;;  %v181_v32 = vrot.slane %v180_v30, 2 }
 0x107   :  { %v170_v33 = vrot.slane %v169_v31, 1  ;;  %v182_v34 = vadd.f32 %v181_v32, %v180_v30 }
 0x109   :  { %v183_v35 = vrot.slane %v182_v34, 1  ;;  %v171_v36 = vadd.f32 %v170_v33, %v169_v31 }
 0x10b   :  { %v184_v37 = vadd.f32 %v183_v35, %v182_v34 }
 0x10d   :  { %v186_v38 = vsel %vm185_vm0, %v171_v36, %v184_v37 }
 0x10e   :  { %v188_v39 = vsel %vm187_vm1, %v186_v38, 0.0 }
 0x10f   :  { %189 = vst [vmem:[%s329_s3] sm:$0xff] %v188_v39 }

// kernel: _hourglass_forward.17
= control target key start
LH: loop header
LB: loop body
LE: loop exit
PB: predicated region body
PF: predicated region fallthrough
CT: control target
= control target key end

     0   :  { %s140_s0 = inlined_call_operand.vmem [shape: bf16[32,128], index: 0, kind: input, shape index: {}]   ;;  %s141_s1 = inlined_call_operand.vmem [shape: f32[1,128], index: 1, kind: input, shape index: {}]   ;;  %s142_s2 = inlined_call_operand.vmem [shape: f32[1,128], index: 2, kind: input, shape index: {}]   ;;  %s143_s3 = inlined_call_operand.vmem [shape: bf16[32,128], index: 3, kind: output, shape index: {}]  }
   0x1   :  { %v83_v0 = vld [vmem:[%s140_s0] sm:$0xff]   ;;  %v100_v4 = vld [vmem:[%s140_s0 + $0x8] sm:$0xff]  }
   0x2   :  { %v72_v1 = vld [vmem:[%s141_s1] ss:$0 sm:$0xff]  ;;  %v84_v2 = vunpack.c.l.bf16 %v83_v0  ;;  %v85_v3 = vunpack.c.h.bf16 %v83_v0  ;;  %v88_v6 = vunpack.c.l.bf16 %v100_v4  ;;  %v89_v7 = vunpack.c.h.bf16 %v100_v4 }
   0x3   :  { %v73_v5 = vld [vmem:[%s142_s2] ss:$0 sm:$0xff] }
   0x4   :  { %v29_v8 = vmul.f32 %v84_v2, %v72_v1  ;;  %v30_v9 = vmul.f32 %v85_v3, %v72_v1  ;;  %v31_v10 = vmul.f32 %v88_v6, %v72_v1  ;;  %v32_v11 = vmul.f32 %v89_v7, %v72_v1 }
   0x6   :  { %v40_v12 = vadd.f32 %v73_v5, %v29_v8  ;;  %v41_v13 = vadd.f32 %v73_v5, %v30_v9  ;;  %v42_v14 = vadd.f32 %v73_v5, %v31_v10  ;;  %v43_v15 = vadd.f32 %v73_v5, %v32_v11 }
   0x8   :  { %v44_v16 = vmax.f32 %v40_v12, 0.0  ;;  %v45_v17 = vmax.f32 %v41_v13, 0.0  ;;  %v46_v18 = vmax.f32 %v42_v14, 0.0  ;;  %v47_v19 = vmax.f32 %v43_v15, 0.0 }
   0xa   :  { %v93_v20 = vpack.c.bf16 %v45_v17, %v44_v16  ;;  %v98_v21 = vpack.c.bf16 %v47_v19, %v46_v18 }
   0xc   :  { %94 = vst [vmem:[%s143_s3] sm:$0xff] %v93_v20   ;;  %101 = vst [vmem:[%s143_s3 + $0x8] sm:$0xff] %v98_v21  }

// kernel: tile.28
= control target key start
LH: loop header
LB: loop body
LE: loop exit
PB: predicated region body
PF: predicated region fallthrough
CT: control target
= control target key end

     0   :  { %s22_s0 = inlined_call_operand.vmem [shape: f32[8], index: 0, kind: input, shape index: {}]   ;;  %s23_s1 = inlined_call_operand.vmem [shape: f32[4,8], index: 1, kind: output, shape index: {}]  }
   0x1   :  { %v4_v0 = vld [vmem:[%s22_s0] ss:$0 sm:$0xff] }
   0x2   :  { %5 = vst [vmem:[%s23_s1] sm:$0xf] %v4_v0 }

// kernel: tile.29
= control target key start
LH: loop header
LB: loop body
LE: loop exit
PB: predicated region body
PF: predicated region fallthrough
CT: control target
= control target key end

     0   :  { %vm7_vm0 = vcmask 64512   ;;  %s37_s8 = smov 8   ;;  %s38_s9 = smov 16   ;;  %vm13_vm1 = vcmask 261312   ;;  %vm19_vm2 = vcmask 195712   ;;  %vm25_vm3 = vcmask 130112   ;;  %s55_s0 = inlined_call_operand.vmem [shape: f32[4,8], index: 0, kind: input, shape index: {}]   ;;  %s56_s1 = inlined_call_operand.vmem [shape: f32[32], index: 1, kind: output, shape index: {}]  }
   0x1   :  { %v4_v0 = vld [vmem:[%s55_s0] sm:$0xf]  ;;  %s36_s0 = smov 24  }
   0x2   :  { %5 = vst [vmem:[#allocation1] sm:$0xf] %v4_v0 }
   0x9   :  { %v10_v1 = vld [vmem:[#allocation1 + $0x3] sm:$0x1]   ;;  %v22_v2 = vld [vmem:[#allocation1 + $0x1] sm:$0x1]   ;;  %v6_v3 = vld [vmem:[#allocation1] sm:$0x1]  }
   0xa   :  { %11 = vrot.lane.b32.xlu0 %v10_v1, %s36_s0  ;;  %23 = vrot.lane.b32.xlu1 %v22_v2, %s37_s8  ;;  %v16_v4 = vld [vmem:[#allocation1 + $0x2] sm:$0x1]   ;;  %8 = vst.msk [vmem:[#allocation0] sm:$0x1] %vm7_vm0, %v6_v3  }
   0xe   :  { %17 = vrot.lane.b32.xlu0 %v16_v4, %s38_s9 }
  0x7c   :  { %v12_v5 = vpop.permute.xlu0 %11   ;;  %v24_v6 = vpop.permute.xlu1 %23  }
  0x7d   :  { %14 = vst.msk [vmem:[#allocation0] sm:$0x1] %vm13_vm1, %v12_v5  }
  0x80   :  { %v18_v7 = vpop.permute.xlu0 %17  }
  0x81   :  { %20 = vst.msk [vmem:[#allocation0] sm:$0x1] %vm19_vm2, %v18_v7  }
  0x82   :  { %26 = vst.msk [vmem:[#allocation0] sm:$0x1] %vm25_vm3, %v24_v6  }
  0x89   :  { %v30_v8 = vld [vmem:[#allocation0] sm:$0x1] }
  0x8a   :  { %32 = vst [vmem:[%s56_s1] sm:$0x1] %v30_v8 }

// kernel: _hourglass_forward.21
= control target key start
LH: loop header
LB: loop body
LE: loop exit
PB: predicated region body
PF: predicated region fallthrough
CT: control target
= control target key end

     0   :  { %s175_s0 = inlined_call_operand.vmem [shape: bf16[32,128], index: 0, kind: input, shape index: {}]   ;;  %s176_s1 = inlined_call_operand.vmem [shape: f32[1,128], index: 1, kind: input, shape index: {}]   ;;  %s177_s2 = inlined_call_operand.vmem [shape: f32[1,128], index: 2, kind: input, shape index: {}]   ;;  %s178_s3 = inlined_call_operand.vmem [shape: bf16[32,128], index: 3, kind: input, shape index: {}]   ;;  %s179_s4 = inlined_call_operand.vmem [shape: bf16[32,128], index: 4, kind: output, shape index: {}]  }
   0x1   :  { %v98_v0 = vld [vmem:[%s175_s0] sm:$0xff]   ;;  %v123_v5 = vld [vmem:[%s175_s0 + $0x8] sm:$0xff]  }
   0x2   :  { %v87_v1 = vld [vmem:[%s176_s1] ss:$0 sm:$0xff]  ;;  %v99_v2 = vunpack.c.l.bf16 %v98_v0  ;;  %v100_v3 = vunpack.c.h.bf16 %v98_v0  ;;  %v124_v6 = vld [vmem:[%s178_s3 + $0x8] sm:$0xff]   ;;  %v103_v8 = vunpack.c.l.bf16 %v123_v5  ;;  %v104_v9 = vunpack.c.h.bf16 %v123_v5 }
   0x3   :  { %v106_v4 = vld [vmem:[%s178_s3] sm:$0xff]   ;;  %v111_v16 = vunpack.c.l.bf16 %v124_v6  ;;  %v112_v17 = vunpack.c.h.bf16 %v124_v6 }
   0x4   :  { %v88_v7 = vld [vmem:[%s177_s2] ss:$0 sm:$0xff]  ;;  %v32_v10 = vmul.f32 %v99_v2, %v87_v1  ;;  %v33_v11 = vmul.f32 %v100_v3, %v87_v1  ;;  %v107_v12 = vunpack.c.l.bf16 %v106_v4  ;;  %v108_v13 = vunpack.c.h.bf16 %v106_v4 }
   0x5   :  { %v34_v14 = vmul.f32 %v103_v8, %v87_v1  ;;  %v35_v15 = vmul.f32 %v104_v9, %v87_v1 }
   0x6   :  { %v43_v18 = vadd.f32 %v88_v7, %v32_v10  ;;  %v44_v19 = vadd.f32 %v88_v7, %v33_v11 }
   0x7   :  { %v45_v20 = vadd.f32 %v88_v7, %v34_v14  ;;  %v46_v21 = vadd.f32 %v88_v7, %v35_v15 }
   0x8   :  { %v55_v22 = vadd.f32 %v107_v12, %v43_v18  ;;  %v56_v23 = vadd.f32 %v108_v13, %v44_v19 }
   0x9   :  { %v57_v24 = vadd.f32 %v111_v16, %v45_v20  ;;  %v58_v25 = vadd.f32 %v112_v17, %v46_v21 }
   0xa   :  { %v59_v26 = vmax.f32 %v55_v22, 0.0  ;;  %v60_v27 = vmax.f32 %v56_v23, 0.0 }
   0xb   :  { %v61_v28 = vmax.f32 %v57_v24, 0.0  ;;  %v62_v29 = vmax.f32 %v58_v25, 0.0 }
   0xc   :  { %v116_v30 = vpack.c.bf16 %v60_v27, %v59_v26 }
   0xd   :  { %v121_v31 = vpack.c.bf16 %v62_v29, %v61_v28 }
   0xe   :  { %117 = vst [vmem:[%s179_s4] sm:$0xff] %v116_v30  }
   0xf   :  { %125 = vst [vmem:[%s179_s4 + $0x8] sm:$0xff] %v121_v31  }

// kernel: tile.38
= control target key start
LH: loop header
LB: loop body
LE: loop exit
PB: predicated region body
PF: predicated region fallthrough
CT: control target
= control target key end

     0   :  { %s22_s0 = inlined_call_operand.vmem [shape: f32[4], index: 0, kind: input, shape index: {}]   ;;  %s23_s1 = inlined_call_operand.vmem [shape: f32[4,4], index: 1, kind: output, shape index: {}]  }
   0x1   :  { %v4_v0 = vld [vmem:[%s22_s0] ss:$0 sm:$0xff] }
   0x2   :  { %5 = vst [vmem:[%s23_s1] sm:$0xf] %v4_v0 }

// kernel: tile.39
= control target key start
LH: loop header
LB: loop body
LE: loop exit
PB: predicated region body
PF: predicated region fallthrough
CT: control target
= control target key end

     0   :  { %vm7_vm0 = vcmask 31744   ;;  %s37_s8 = smov 4   ;;  %s38_s9 = smov 8   ;;  %vm13_vm1 = vcmask 130144   ;;  %vm19_vm2 = vcmask 97344   ;;  %vm25_vm3 = vcmask 64544   ;;  %s55_s0 = inlined_call_operand.vmem [shape: f32[4,4], index: 0, kind: input, shape index: {}]   ;;  %s56_s1 = inlined_call_operand.vmem [shape: f32[16], index: 1, kind: output, shape index: {}]  }
   0x1   :  { %v4_v0 = vld [vmem:[%s55_s0] sm:$0xf]  ;;  %s36_s0 = smov 12  }
   0x2   :  { %5 = vst [vmem:[#allocation1] sm:$0xf] %v4_v0 }
   0x9   :  { %v10_v1 = vld [vmem:[#allocation1 + $0x3] sm:$0x1]   ;;  %v22_v2 = vld [vmem:[#allocation1 + $0x1] sm:$0x1]   ;;  %v6_v3 = vld [vmem:[#allocation1] sm:$0x1]  }
   0xa   :  { %11 = vrot.lane.b32.xlu0 %v10_v1, %s36_s0  ;;  %23 = vrot.lane.b32.xlu1 %v22_v2, %s37_s8  ;;  %v16_v4 = vld [vmem:[#allocation1 + $0x2] sm:$0x1]   ;;  %8 = vst.msk [vmem:[#allocation0] sm:$0x1] %vm7_vm0, %v6_v3  }
   0xe   :  { %17 = vrot.lane.b32.xlu0 %v16_v4, %s38_s9 }
  0x7c   :  { %v12_v5 = vpop.permute.xlu0 %11   ;;  %v24_v6 = vpop.permute.xlu1 %23  }
  0x7d   :  { %14 = vst.msk [vmem:[#allocation0] sm:$0x1] %vm13_vm1, %v12_v5  }
  0x80   :  { %v18_v7 = vpop.permute.xlu0 %17  }
  0x81   :  { %20 = vst.msk [vmem:[#allocation0] sm:$0x1] %vm19_vm2, %v18_v7  }
  0x82   :  { %26 = vst.msk [vmem:[#allocation0] sm:$0x1] %vm25_vm3, %v24_v6  }
  0x89   :  { %v30_v8 = vld [vmem:[#allocation0] sm:$0x1] }
  0x8a   :  { %32 = vst [vmem:[%s56_s1] sm:$0x1] %v30_v8 }

// kernel: _hourglass_forward.23
= control target key start
LH: loop header
LB: loop body
LE: loop exit
PB: predicated region body
PF: predicated region fallthrough
CT: control target
= control target key end

     0   :  { %s251_s0 = inlined_call_operand.vmem [shape: bf16[128,128], index: 0, kind: input, shape index: {}]   ;;  %s252_s1 = inlined_call_operand.vmem [shape: f32[1,128], index: 1, kind: input, shape index: {}]   ;;  %s253_s2 = inlined_call_operand.vmem [shape: f32[1,128], index: 2, kind: input, shape index: {}]   ;;  %s254_s3 = inlined_call_operand.vmem [shape: f32[128,128], index: 3, kind: output, shape index: {}]  }
   0x1   :  { %v115_v0 = vld [vmem:[%s251_s0] sm:$0xff]   ;;  %v146_v4 = vld [vmem:[%s251_s0 + $0x8] sm:$0xff]   ;;  %v147_v5 = vld [vmem:[%s251_s0 + $0x10] sm:$0xff]  }
   0x2   :  { %v112_v1 = vld [vmem:[%s252_s1] ss:$0 sm:$0xff]  ;;  %v116_v2 = vunpack.c.l.bf16 %v115_v0  ;;  %v117_v3 = vunpack.c.h.bf16 %v115_v0  ;;  %v148_v6 = vld [vmem:[%s251_s0 + $0x18] sm:$0xff]   ;;  %v120_v8 = vunpack.c.l.bf16 %v146_v4  ;;  %v121_v9 = vunpack.c.h.bf16 %v146_v4  ;;  %v150_v25 = vld [vmem:[%s251_s0 + $0x28] sm:$0xff]  }
   0x3   :  { %v113_v7 = vld [vmem:[%s253_s2] ss:$0 sm:$0xff]  ;;  %v124_v10 = vunpack.c.l.bf16 %v147_v5  ;;  %v125_v11 = vunpack.c.h.bf16 %v147_v5  ;;  %v128_v14 = vunpack.c.l.bf16 %v148_v6  ;;  %v129_v15 = vunpack.c.h.bf16 %v148_v6  ;;  %v151_v26 = vld [vmem:[%s251_s0 + $0x30] sm:$0xff]   ;;  %v152_v31 = vld [vmem:[%s251_s0 + $0x38] sm:$0xff]  }
   0x4   :  { %v53_v12 = vmul.f32 %v116_v2, %v112_v1  ;;  %v54_v13 = vmul.f32 %v117_v3, %v112_v1  ;;  %v55_v16 = vmul.f32 %v120_v8, %v112_v1  ;;  %v56_v17 = vmul.f32 %v121_v9, %v112_v1  ;;  %v149_v20 = vld [vmem:[%s251_s0 + $0x20] sm:$0xff]  }
   0x5   :  { %v57_v18 = vmul.f32 %v124_v10, %v112_v1  ;;  %v58_v19 = vmul.f32 %v125_v11, %v112_v1  ;;  %v59_v23 = vmul.f32 %v128_v14, %v112_v1  ;;  %v60_v24 = vmul.f32 %v129_v15, %v112_v1 }
   0x6   :  { %v76_v21 = vadd.f32 %v113_v7, %v53_v12  ;;  %v77_v22 = vadd.f32 %v113_v7, %v54_v13  ;;  %v78_v27 = vadd.f32 %v113_v7, %v55_v16  ;;  %v79_v28 = vadd.f32 %v113_v7, %v56_v17 }
   0x7   :  { %v80_v29 = vadd.f32 %v113_v7, %v57_v18  ;;  %v81_v30 = vadd.f32 %v113_v7, %v58_v19  ;;  %v82_v32 = vadd.f32 %v113_v7, %v59_v23  ;;  %v83_v33 = vadd.f32 %v113_v7, %v60_v24 }
   0x8   :  { %92 = vst [vmem:[%s254_s3] sm:$0xff] %v76_v21  ;;  %93 = vst [vmem:[%s254_s3 + $0x8] sm:$0xff] %v77_v22  ;;  %v132_v34 = vunpack.c.l.bf16 %v149_v20  ;;  %v133_v35 = vunpack.c.h.bf16 %v149_v20  ;;  %v136_v36 = vunpack.c.l.bf16 %v150_v25  ;;  %v137_v37 = vunpack.c.h.bf16 %v150_v25 }
   0x9   :  { %94 = vst [vmem:[%s254_s3 + $0x10] sm:$0xff] %v78_v27  ;;  %95 = vst [vmem:[%s254_s3 + $0x18] sm:$0xff] %v79_v28  ;;  %v140_v38 = vunpack.c.l.bf16 %v151_v26  ;;  %v141_v39 = vunpack.c.h.bf16 %v151_v26  ;;  %v144_v42 = vunpack.c.l.bf16 %v152_v31  ;;  %v145_v43 = vunpack.c.h.bf16 %v152_v31 }
   0xa   :  { %96 = vst [vmem:[%s254_s3 + $0x20] sm:$0xff] %v80_v29  ;;  %97 = vst [vmem:[%s254_s3 + $0x28] sm:$0xff] %v81_v30  ;;  %v61_v40 = vmul.f32 %v132_v34, %v112_v1  ;;  %v62_v41 = vmul.f32 %v133_v35, %v112_v1  ;;  %v63_v44 = vmul.f32 %v136_v36, %v112_v1 }
   0xb   :  { %98 = vst [vmem:[%s254_s3 + $0x30] sm:$0xff] %v82_v32  ;;  %99 = vst [vmem:[%s254_s3 + $0x38] sm:$0xff] %v83_v33  ;;  %v64_v45 = vmul.f32 %v137_v37, %v112_v1  ;;  %v65_v46 = vmul.f32 %v140_v38, %v112_v1  ;;  %v66_v47 = vmul.f32 %v141_v39, %v112_v1 }
   0xc   :  { %v84_v48 = vadd.f32 %v113_v7, %v61_v40  ;;  %v85_v49 = vadd.f32 %v113_v7, %v62_v41  ;;  %v67_v50 = vmul.f32 %v144_v42, %v112_v1  ;;  %v68_v51 = vmul.f32 %v145_v43, %v112_v1 }
   0xd   :  { %v86_v52 = vadd.f32 %v113_v7, %v63_v44  ;;  %v87_v53 = vadd.f32 %v113_v7, %v64_v45  ;;  %v88_v54 = vadd.f32 %v113_v7, %v65_v46  ;;  %v89_v55 = vadd.f32 %v113_v7, %v66_v47 }
   0xe   :  { %100 = vst [vmem:[%s254_s3 + $0x40] sm:$0xff] %v84_v48  ;;  %101 = vst [vmem:[%s254_s3 + $0x48] sm:$0xff] %v85_v49  ;;  %v90_v56 = vadd.f32 %v113_v7, %v67_v50  ;;  %v91_v57 = vadd.f32 %v113_v7, %v68_v51 }
   0xf   :  { %102 = vst [vmem:[%s254_s3 + $0x50] sm:$0xff] %v86_v52  ;;  %103 = vst [vmem:[%s254_s3 + $0x58] sm:$0xff] %v87_v53 }
  0x10   :  { %104 = vst [vmem:[%s254_s3 + $0x60] sm:$0xff] %v88_v54  ;;  %105 = vst [vmem:[%s254_s3 + $0x68] sm:$0xff] %v89_v55 }
  0x11   :  { %106 = vst [vmem:[%s254_s3 + $0x70] sm:$0xff] %v90_v56  ;;  %107 = vst [vmem:[%s254_s3 + $0x78] sm:$0xff] %v91_v57 }

</bundles_post_ra>
